<compile_context>
chip_gen: v7x
topology: tpu7x:2x2x1
jax: 0.10.0
libtpu: 0.0.40
codegen_flags: <defaults>
</compile_context>

<pallas_src>
import functools

import jax
import jax.numpy as jnp
from jax.experimental import pallas as pl
from jax.experimental.pallas import tpu as pltpu


# ----------------------------------------------------------------------------
# helpers
# ----------------------------------------------------------------------------
def _round_up(x, m):
    return ((x + m - 1) // m) * m


def _default_exp_in_bf16():
    """bf16 EUP exists on v6e/v7x; keep f32 exp on v5e and older."""
    try:
        kind = jax.devices()[0].device_kind.lower()
    except Exception:
        return False
    if "tpu" not in kind:
        return False
    for old in ("v2", "v3", "v4", "v5"):
        if old in kind:
            return False
    return True


# Double-buffered per-step working-set budget.  Chosen so the largest config
# comfortably fits v7x's 64 MiB per-core VMEM (with headroom for labels blocks,
# partial-output blocks, scratch and compiler internals); v5e/v6e have 128 MiB.
_VMEM_TILE_BUDGET = 36 << 20


def _pick_tiles(N, H, V, logit_bytes, tile_n, tile_v):
    auto_v = tile_v is None
    auto_n = tile_n is None

    # vocab tile: largest power-of-two multiple of 128 (<= 4096) dividing V,
    # else fall back to the full V (always legal as a block dim).
    if auto_v:
        tile_v = V
        for cand in (4096, 2048, 1024, 512, 256, 128):
            if V % cand == 0:
                tile_v = cand
                break
    assert V % tile_v == 0, (V, tile_v)

    # row tile: multiple of 16 (bf16 sublane packing), <= 1024, and capped so
    # the padded row grid has >= 2 tiles (both v7x TensorCores get work).
    if auto_n:
        n_r16 = max(16, _round_up(N, 16))
        cap = _round_up(-(-n_r16 // 2), 16) if n_r16 > 16 else 16
        tile_n = min(1024, cap)
    assert tile_n % 8 == 0, tile_n

    def working_set(tn, tv):
        # double-buffered hidden (bf16) + W^T (bf16) + logits blocks
        return 2 * (tn * H * 2 + H * tv * 2 + tn * tv * logit_bytes)

    if auto_v:
        while (working_set(tile_n, tile_v) > _VMEM_TILE_BUDGET
               and tile_v > 512 and V % (tile_v // 2) == 0):
            tile_v //= 2
    if auto_n:
        while working_set(tile_n, tile_v) > _VMEM_TILE_BUDGET and tile_n > 16:
            tile_n = max(16, (tile_n // 2 // 16) * 16)

    return tile_n, tile_v


# ----------------------------------------------------------------------------
# Pallas kernel: lm-head matmul + online-LSE masked cross-entropy
# ----------------------------------------------------------------------------
def _lm_head_ce_kernel(hidden_ref, wt_ref, labels_ref, *refs,
                       exp_in_bf16, with_logits):
    if with_logits:
        logits_ref, losssum_ref, count_ref, m_scr, l_scr, p_scr = refs
    else:
        losssum_ref, count_ref, m_scr, l_scr, p_scr = refs

    j = pl.program_id(1)
    nj = pl.num_programs(1)
    tv = wt_ref.shape[1]

    @pl.when(j == 0)
    def _():
        m_scr[...] = jnp.full(m_scr.shape, -jnp.inf, m_scr.dtype)
        l_scr[...] = jnp.zeros(l_scr.shape, l_scr.dtype)
        p_scr[...] = jnp.zeros(p_scr.shape, p_scr.dtype)

    # bf16 MXU matmul, f32 accumulation: [tn, H] x [H, tv] -> [tn, tv]
    logits = jax.lax.dot_general(
        hidden_ref[...], wt_ref[...],
        dimension_numbers=(((1,), (0,)), ((), ())),
        preferred_element_type=jnp.float32,
    )
    if with_logits:
        logits_ref[...] = logits.astype(logits_ref.dtype)

    labels = labels_ref[...]                       # [tn, 1] int32, -100 = ignore
    valid = labels != -100
    safe = jnp.where(valid, labels, 0)

    # picked target logit: lane iota (1, tv) vs (label - j*tv) broadcast; avoids
    # materializing a full (tn, tv) iota + add every grid step.
    local_ids = jax.lax.broadcasted_iota(jnp.int32, (1, tv), 1)   # [1, tv]
    local_lbl = safe - j * tv                                     # [tn, 1]
    hit = local_ids == local_lbl                                  # [tn, tv]
    p_scr[...] += jnp.sum(jnp.where(hit, logits, 0.0), axis=-1, keepdims=True)

    # online log-sum-exp across the vocab sweep (running stats in f32)
    m_prev = m_scr[...]
    m_new = jnp.maximum(m_prev, jnp.max(logits, axis=-1, keepdims=True))
    x = logits - m_new
    if exp_in_bf16:
        # v6e/v7x: bf16 EUP roughly doubles exp throughput; sum stays f32.
        e = jnp.exp(x.astype(jnp.bfloat16)).astype(jnp.float32)
    else:
        e = jnp.exp(x)
    l_scr[...] = (jnp.exp(m_prev - m_new) * l_scr[...]
                  + jnp.sum(e, axis=-1, keepdims=True))
    m_scr[...] = m_new

    @pl.when(j == nj - 1)
    def _():
        lse = m_scr[...] + jnp.log(l_scr[...])                 # [tn, 1]
        per_tok = jnp.where(valid, lse - p_scr[...], 0.0)      # [tn, 1]
        loss_sum = jnp.sum(per_tok)
        n_valid = jnp.sum(valid.astype(jnp.float32))
        # lane-dense partial outputs, one block per N tile
        losssum_ref[...] = jnp.full(losssum_ref.shape, loss_sum, jnp.float32)
        count_ref[...] = jnp.full(count_ref.shape, n_valid, jnp.float32)


def lm_head_and_ce(hidden_flat, w_t, labels_flat, *,
                   tile_n=None, tile_v=None,
                   return_logits=True, logits_dtype=jnp.bfloat16,
                   exp_in_bf16=None, w_buffers=2):
    """hidden_flat: [N, H] float, w_t: [H, V] (pre-transposed tied embedding),
    labels_flat: [N, 1] int32 with -100 = ignore.
    Returns (logits [N, V] in `logits_dtype` or None, scalar mean CE loss)."""
    N, H = hidden_flat.shape
    V = w_t.shape[1]
    if exp_in_bf16 is None:
        exp_in_bf16 = _default_exp_in_bf16()
    logit_bytes = jnp.dtype(logits_dtype).itemsize if return_logits else 0

    # pad contraction dim to a multiple of 128 (clean MXU mapping); zero rows
    # in W^T / zero cols in hidden do not change the matmul result.
    h_pad = _round_up(H, 128)
    if h_pad != H:
        hidden_flat = jnp.pad(hidden_flat, ((0, 0), (0, h_pad - H)))
        w_t = jnp.pad(w_t, ((0, h_pad - H), (0, 0)))

    tile_n, tile_v = _pick_tiles(N, h_pad, V, logit_bytes, tile_n, tile_v)

    # pad rows up to a multiple of tile_n; pad rows get label -100 (no loss)
    n_pad = _round_up(N, tile_n)
    if n_pad != N:
        hidden_flat = jnp.pad(hidden_flat, ((0, n_pad - N), (0, 0)))
        labels_flat = jnp.pad(labels_flat, ((0, n_pad - N), (0, 0)),
                              constant_values=-100)

    hidden_bf16 = hidden_flat.astype(jnp.bfloat16)
    w_t = w_t.astype(jnp.bfloat16)
    labels_flat = labels_flat.astype(jnp.int32)

    n_i, n_j = n_pad // tile_n, V // tile_v

    # optional deeper buffering on the only per-step streamed input (W^T)
    w_spec_kwargs = {}
    if w_buffers is not None and w_buffers != 2:
        w_spec_kwargs["pipeline_mode"] = pl.Buffered(w_buffers)

    in_specs = [
        pl.BlockSpec((tile_n, h_pad), lambda i, j: (i, 0)),              # hidden
        pl.BlockSpec((h_pad, tile_v), lambda i, j: (0, j), **w_spec_kwargs),  # W^T
        pl.BlockSpec((tile_n, 1), lambda i, j: (i, 0)),                  # labels
    ]

    out_specs = []
    out_shapes = []
    if return_logits:
        out_specs.append(pl.BlockSpec((tile_n, tile_v), lambda i, j: (i, j)))
        out_shapes.append(jax.ShapeDtypeStruct((n_pad, V), logits_dtype))
    out_specs += [
        pl.BlockSpec((1, 8, 128), lambda i, j: (i, 0, 0)),   # partial loss sums
        pl.BlockSpec((1, 8, 128), lambda i, j: (i, 0, 0)),   # partial valid counts
    ]
    out_shapes += [
        jax.ShapeDtypeStruct((n_i, 8, 128), jnp.float32),
        jax.ShapeDtypeStruct((n_i, 8, 128), jnp.float32),
    ]

    grid_spec = pltpu.PrefetchScalarGridSpec(
        num_scalar_prefetch=0,
        grid=(n_i, n_j),
        in_specs=in_specs,
        out_specs=tuple(out_specs),
        scratch_shapes=[
            pltpu.VMEM((tile_n, 1), jnp.float32),   # running max
            pltpu.VMEM((tile_n, 1), jnp.float32),   # running sum-exp
            pltpu.VMEM((tile_n, 1), jnp.float32),   # picked target logit
        ],
    )

    # VMEM limit: generous over-estimate of the double-buffered working set,
    # capped at 56 MiB so it is also safe on v7x's 64 MiB per-core VMEM.
    ws = 2 * (tile_n * h_pad * 2 + h_pad * tile_v * 2
              + tile_n * tile_v * logit_bytes)
    scratch_bytes = 3 * tile_n * 128 * 4 + 2 * 2 * 8 * 128 * 4
    vmem_limit = int(ws * 1.4) + scratch_bytes + (8 << 20)
    vmem_limit = max(32 << 20, min(vmem_limit, 56 << 20))

    cost = pl.CostEstimate(
        flops=int(2.0 * n_pad * V * h_pad),
        transcendentals=int(n_pad) * int(V),
        bytes_accessed=int(2 * n_pad * h_pad            # bf16 hidden
                           + 2 * h_pad * V * n_i        # W^T re-streamed per row tile
                           + 4 * n_pad                  # labels
                           + n_pad * V * logit_bytes),  # logits writeback
    )

    kernel = functools.partial(_lm_head_ce_kernel,
                               exp_in_bf16=exp_in_bf16,
                               with_logits=return_logits)

    outs = pl.pallas_call(
        kernel,
        out_shape=tuple(out_shapes),
        grid_spec=grid_spec,
        compiler_params=pltpu.CompilerParams(
            dimension_semantics=("parallel", "arbitrary"),
            vmem_limit_bytes=vmem_limit),
        cost_estimate=cost,
    )(hidden_bf16, w_t, labels_flat)

    if return_logits:
        logits_pad, loss_parts, count_parts = outs
        logits = logits_pad[:N]
    else:
        loss_parts, count_parts = outs
        logits = None

    loss_sum = jnp.sum(loss_parts[:, 0, 0])
    n_valid = jnp.sum(count_parts[:, 0, 0])
    loss = loss_sum / jnp.maximum(n_valid, 1.0)
    return logits, loss


# ----------------------------------------------------------------------------
# DatatunerModel forward (JAX glue around the Pallas hot path)
# ----------------------------------------------------------------------------
class DatatunerModelPallas:
    def __init__(self, vocab_size, hidden, pad_token_id=0, seed=0,
                 tile_n=None, tile_v=None, logits_dtype=jnp.bfloat16,
                 return_logits=True, exp_in_bf16=None, w_buffers=2):
        self.vocab_size = vocab_size
        self.hidden = hidden
        self.pad_token_id = pad_token_id
        self.tile_n = tile_n
        self.tile_v = tile_v
        self.logits_dtype = logits_dtype
        self.return_logits = return_logits
        self.exp_in_bf16 = exp_in_bf16
        self.w_buffers = w_buffers
        key = jax.random.PRNGKey(seed)
        # tied embedding / output projection  [V, H]  (f32 for lookups)
        self.embedding = (
            jax.random.normal(key, (vocab_size, hidden), jnp.float32) * 0.02
        )
        # pre-transposed bf16 copy for the MXU lm-head (computed once, cached)
        self.w_t = jnp.asarray(self.embedding.T, dtype=jnp.bfloat16)

    def _shift_right(self, labels):
        # HF-style: prepend decoder-start (= pad here), drop last, -100 -> pad
        B = labels.shape[0]
        start = jnp.full((B, 1), self.pad_token_id, dtype=labels.dtype)
        shifted = jnp.concatenate([start, labels[:, :-1]], axis=1)
        return jnp.where(shifted == -100, self.pad_token_id, shifted)

    def _hidden_and_labels(self, batch):
        source_ids = batch["source_input_ids"].astype(jnp.int32)        # [B, S]
        source_mask = batch["source_attention_mask"].astype(jnp.int32)  # [B, S]
        target_ids = batch["target_input_ids"].astype(jnp.int32)        # [B, T]

        # target_ids[target_ids == pad] = -100
        labels = jnp.where(target_ids == self.pad_token_id, -100, target_ids)

        # --- tiny synthetic "model" (stand-in for the wrapped HF seq2seq) ---
        # encoder: masked mean-pool of source embeddings -> context [B, H]
        src_emb = jnp.take(self.embedding, source_ids, axis=0)          # [B, S, H]
        mask_f = source_mask.astype(jnp.float32)[..., None]             # [B, S, 1]
        context = jnp.sum(src_emb * mask_f, axis=1) / jnp.maximum(
            jnp.sum(mask_f, axis=1), 1.0
        )                                                               # [B, H]

        # decoder input embeddings + broadcast encoder context
        dec_in = self._shift_right(labels)                              # [B, T]
        dec_emb = jnp.take(self.embedding, dec_in, axis=0)              # [B, T, H]
        hidden_states = dec_emb + context[:, None, :]                   # [B, T, H]

        B, T, H = hidden_states.shape
        return hidden_states.reshape(B * T, H), labels.reshape(B * T, 1), (B, T)

    def forward(self, batch):
        hidden_flat, labels_flat, (B, T) = self._hidden_and_labels(batch)

        # --- Pallas hot path: tiled lm-head matmul + online masked CE ---
        logits_flat, loss = lm_head_and_ce(
            hidden_flat, self.w_t, labels_flat,
            tile_n=self.tile_n, tile_v=self.tile_v,
            return_logits=self.return_logits, logits_dtype=self.logits_dtype,
            exp_in_bf16=self.exp_in_bf16, w_buffers=self.w_buffers)

        logits = (logits_flat.reshape(B, T, self.vocab_size)
                  if logits_flat is not None else None)

        # TODO(synk): consistency / semantic-fidelity / DCS auxiliary losses
        # need tokenizer string round-trips; only the default CE path is here.
        return loss, logits


# ----------------------------------------------------------------------------
# Pure-JAX reference (same bf16 lm-head inputs, f32 accumulation) for checking
# ----------------------------------------------------------------------------
def _reference_lm_head_ce(hidden_flat, w_t, labels_flat):
    logits = jnp.dot(hidden_flat.astype(jnp.bfloat16), w_t.astype(jnp.bfloat16),
                     preferred_element_type=jnp.float32)                # [N, V]
    yf = labels_flat.reshape(-1)
    valid = yf != -100
    safe = jnp.where(valid, yf, 0)
    lse = jax.scipy.special.logsumexp(logits, axis=-1)
    picked = jnp.take_along_axis(logits, safe[:, None], axis=-1)[:, 0]
    per = jnp.where(valid, lse - picked, 0.0)
    loss = jnp.sum(per) / jnp.maximum(jnp.sum(valid.astype(jnp.float32)), 1.0)
    return loss, logits


if __name__ == "__main__":
    # small shapes, but the explicit tiles give a grid with multiple tiles on
    # BOTH axes (2 row tiles incl. padding, 4 vocab tiles) and the -100 mask
    # is exercised.
    B, S, T, H, V = 4, 8, 9, 32, 512
    PAD = 0

    key = jax.random.PRNGKey(0)
    k1, k2 = jax.random.split(key, 2)

    source_ids = jax.random.randint(k1, (B, S), 1, V, dtype=jnp.int32)
    source_mask = jnp.ones((B, S), jnp.int32).at[1, 6:].set(0).at[3, 4:].set(0)
    source_ids = source_ids * source_mask  # padded positions -> PAD (0)

    target_ids = jax.random.randint(k2, (B, T), 1, V, dtype=jnp.int32)
    tgt_pad_mask = (jnp.ones((B, T), jnp.int32)
                    .at[0, 6:].set(0).at[1, 5:].set(0).at[2, 8:].set(0))
    target_ids = target_ids * tgt_pad_mask

    batch = {
        "source_input_ids": source_ids,
        "source_attention_mask": source_mask,
        "target_input_ids": target_ids,
    }

    # toy-sized explicit tiles (defaults auto-pick up to 1024 x 4096 at scale)
    model = DatatunerModelPallas(vocab_size=V, hidden=H, pad_token_id=PAD,
                                 seed=0, tile_n=32, tile_v=128)
    loss, logits = model.forward(batch)
    loss = jax.block_until_ready(loss)
    logits = jax.block_until_ready(logits)

    assert logits.shape == (B, T, V)
    assert bool(jnp.isfinite(loss))

    # reference on exactly the same bf16 lm-head inputs
    hidden_flat, labels_flat, _ = model._hidden_and_labels(batch)
    ref_loss, ref_logits = _reference_lm_head_ce(hidden_flat, model.w_t,
                                                 labels_flat)
    assert jnp.allclose(loss, ref_loss, atol=2e-2, rtol=2e-3), (loss, ref_loss)
    assert jnp.allclose(logits.reshape(-1, V).astype(jnp.float32), ref_logits,
                        atol=2e-3, rtol=5e-2), "logits mismatch"

    # also exercise the default (auto-picked) tiles and the loss-only fast path
    _, loss2 = lm_head_and_ce(hidden_flat, model.w_t, labels_flat,
                              return_logits=False)
    loss2 = jax.block_until_ready(loss2)
    assert jnp.allclose(loss2, ref_loss, atol=2e-2, rtol=2e-3), (loss2, ref_loss)

    print("KERNEL_OK")
</pallas_src>

<mosaic_0001>
module attributes {stable_mosaic.version = 11 : i64} {
  func.func @_lm_head_ce_kernel(%arg0: i32, %arg1: i32, %arg2: memref<32x128xbf16, #tpu.memory_space<vmem>>, %arg3: memref<128x128xbf16, #tpu.memory_space<vmem>>, %arg4: memref<32x1xi32, #tpu.memory_space<vmem>>, %arg5: memref<32x128xbf16, #tpu.memory_space<vmem>>, %arg6: memref<1x8x128xf32, #tpu.memory_space<vmem>>, %arg7: memref<1x8x128xf32, #tpu.memory_space<vmem>>, %arg8: memref<32x1xf32, #tpu.memory_space<vmem>>, %arg9: memref<32x1xf32, #tpu.memory_space<vmem>>, %arg10: memref<32x1xf32, #tpu.memory_space<vmem>>) attributes {dimension_semantics = [#tpu.dimension_semantics<parallel>, #tpu.dimension_semantics<arbitrary>], iteration_bounds = array<i64: 2, 4>, scalar_prefetch = 0 : i64, scratch_operands = 3 : i64, tpu.core_type = #tpu.core_type<tc>, window_params = [{transform_indices = @transform_0, window_bounds = array<i64: 32, 128>}, {transform_indices = @transform_1, window_bounds = array<i64: 128, 128>}, {transform_indices = @transform_2, window_bounds = array<i64: 32, 1>}, {transform_indices = @transform_3, window_bounds = array<i64: 32, 128>}, {transform_indices = @transform_4, window_bounds = array<i64: 1, 8, 128>}, {transform_indices = @transform_5, window_bounds = array<i64: 1, 8, 128>}]} {
    %c0_i32 = arith.constant 0 : i32
    %0 = arith.cmpi eq, %arg1, %c0_i32 : i32
    %1 = arith.extui %0 : i1 to i32
    %c0_i32_0 = arith.constant 0 : i32
    %2 = arith.cmpi ne, %1, %c0_i32_0 : i32
    scf.if %2 {
      %cst_26 = arith.constant 0xFF800000 : f32
      %46 = vector.broadcast %cst_26 : f32 to vector<32x1xf32>
      %c0_27 = arith.constant 0 : index
      %c0_28 = arith.constant 0 : index
      %47 = vector.load %arg8[%c0_27, %c0_28] : memref<32x1xf32, #tpu.memory_space<vmem>>, vector<32x1xf32>
      tpu.vector_store %arg8[%c0_27, %c0_28], %46 {strides = array<i32>} : memref<32x1xf32, #tpu.memory_space<vmem>>, vector<32x1xf32>,
      %cst_29 = arith.constant 0.000000e+00 : f32
      %48 = vector.broadcast %cst_29 : f32 to vector<32x1xf32>
      %c0_30 = arith.constant 0 : index
      %c0_31 = arith.constant 0 : index
      %49 = vector.load %arg9[%c0_30, %c0_31] : memref<32x1xf32, #tpu.memory_space<vmem>>, vector<32x1xf32>
      tpu.vector_store %arg9[%c0_30, %c0_31], %48 {strides = array<i32>} : memref<32x1xf32, #tpu.memory_space<vmem>>, vector<32x1xf32>,
      %cst_32 = arith.constant 0.000000e+00 : f32
      %50 = vector.broadcast %cst_32 : f32 to vector<32x1xf32>
      %c0_33 = arith.constant 0 : index
      %c0_34 = arith.constant 0 : index
      %51 = vector.load %arg10[%c0_33, %c0_34] : memref<32x1xf32, #tpu.memory_space<vmem>>, vector<32x1xf32>
      tpu.vector_store %arg10[%c0_33, %c0_34], %50 {strides = array<i32>} : memref<32x1xf32, #tpu.memory_space<vmem>>, vector<32x1xf32>,
    } else {
    }
    %c0 = arith.constant 0 : index
    %c0_1 = arith.constant 0 : index
    %3 = vector.load %arg2[%c0, %c0_1] : memref<32x128xbf16, #tpu.memory_space<vmem>>, vector<32x128xbf16>
    %c0_2 = arith.constant 0 : index
    %c0_3 = arith.constant 0 : index
    %4 = vector.load %arg3[%c0_2, %c0_3] : memref<128x128xbf16, #tpu.memory_space<vmem>>, vector<128x128xbf16>
    %cst = arith.constant dense<0.000000e+00> : vector<32x128xf32>
    %5 = tpu.matmul %3, %4, %cst {dimension_numbers = #tpu.dot_dimension_numbers<[1], [0], [0], [1], [0, 0, 1, 1], [], []>} : vector<32x128xbf16>, vector<128x128xbf16>, vector<32x128xf32> -> vector<32x128xf32>
    %6 = arith.truncf %5 : vector<32x128xf32> to vector<32x128xbf16>
    %c0_4 = arith.constant 0 : index
    %c0_5 = arith.constant 0 : index
    %7 = vector.load %arg5[%c0_4, %c0_5] : memref<32x128xbf16, #tpu.memory_space<vmem>>, vector<32x128xbf16>
    tpu.vector_store %arg5[%c0_4, %c0_5], %6 {strides = array<i32>} : memref<32x128xbf16, #tpu.memory_space<vmem>>, vector<32x128xbf16>,
    %c0_6 = arith.constant 0 : index
    %c0_7 = arith.constant 0 : index
    %8 = vector.load %arg4[%c0_6, %c0_7] : memref<32x1xi32, #tpu.memory_space<vmem>>, vector<32x1xi32>
    %c-100_i32 = arith.constant -100 : i32
    %9 = vector.broadcast %c-100_i32 : i32 to vector<32x1xi32>
    %10 = arith.cmpi ne, %8, %9 : vector<32x1xi32>
    %c0_i32_8 = arith.constant 0 : i32
    %11 = vector.broadcast %c0_i32_8 : i32 to vector<32x1xi32>
    %12 = arith.select %10, %8, %11 : vector<32x1xi1>, vector<32x1xi32>
    %13 = tpu.iota {dimensions = array<i32: 1>} : vector<1x128xi32>
    %c128_i32 = arith.constant 128 : i32
    %14 = arith.muli %arg1, %c128_i32 : i32
    %15 = vector.broadcast %14 : i32 to vector<32x1xi32>
    %16 = arith.subi %12, %15 : vector<32x1xi32>
    %17 = vector.broadcast %13 : vector<1x128xi32> to vector<32x128xi32>
    %18 = vector.broadcast %16 : vector<32x1xi32> to vector<32x128xi32>
    %19 = arith.cmpi eq, %17, %18 : vector<32x128xi32>
    %c0_9 = arith.constant 0 : index
    %c0_10 = arith.constant 0 : index
    %20 = vector.load %arg10[%c0_9, %c0_10] : memref<32x1xf32, #tpu.memory_space<vmem>>, vector<32x1xf32>
    %cst_11 = arith.constant 0.000000e+00 : f32
    %21 = vector.broadcast %cst_11 : f32 to vector<32x128xf32>
    %22 = arith.select %19, %5, %21 : vector<32x128xi1>, vector<32x128xf32>
    %cst_12 = arith.constant dense<0.000000e+00> : vector<32xf32>
    %23 = vector.multi_reduction <add>, %22, %cst_12 [1] : vector<32x128xf32> to vector<32xf32>
    %24 = vector.shape_cast %23 : vector<32xf32> to vector<32x1xf32>
    %25 = arith.addf %20, %24 : vector<32x1xf32>
    %c0_13 = arith.constant 0 : index
    %c0_14 = arith.constant 0 : index
    %26 = vector.load %arg10[%c0_13, %c0_14] : memref<32x1xf32, #tpu.memory_space<vmem>>, vector<32x1xf32>
    tpu.vector_store %arg10[%c0_13, %c0_14], %25 {strides = array<i32>} : memref<32x1xf32, #tpu.memory_space<vmem>>, vector<32x1xf32>,
    %c0_15 = arith.constant 0 : index
    %c0_16 = arith.constant 0 : index
    %27 = vector.load %arg8[%c0_15, %c0_16] : memref<32x1xf32, #tpu.memory_space<vmem>>, vector<32x1xf32>
    %cst_17 = arith.constant dense<0xFF800000> : vector<32xf32>
    %28 = vector.multi_reduction <maximumf>, %5, %cst_17 [1] : vector<32x128xf32> to vector<32xf32>
    %29 = vector.shape_cast %28 : vector<32xf32> to vector<32x1xf32>
    %30 = arith.maximumf %27, %29 : vector<32x1xf32>
    %31 = vector.broadcast %30 : vector<32x1xf32> to vector<32x128xf32>
    %32 = arith.subf %5, %31 : vector<32x128xf32>
    %33 = math.exp %32 : vector<32x128xf32>
    %34 = arith.subf %27, %30 : vector<32x1xf32>
    %35 = math.exp %34 : vector<32x1xf32>
    %c0_18 = arith.constant 0 : index
    %c0_19 = arith.constant 0 : index
    %36 = vector.load %arg9[%c0_18, %c0_19] : memref<32x1xf32, #tpu.memory_space<vmem>>, vector<32x1xf32>
    %37 = arith.mulf %35, %36 : vector<32x1xf32>
    %cst_20 = arith.constant dense<0.000000e+00> : vector<32xf32>
    %38 = vector.multi_reduction <add>, %33, %cst_20 [1] : vector<32x128xf32> to vector<32xf32>
    %39 = vector.shape_cast %38 : vector<32xf32> to vector<32x1xf32>
    %40 = arith.addf %37, %39 : vector<32x1xf32>
    %c0_21 = arith.constant 0 : index
    %c0_22 = arith.constant 0 : index
    %41 = vector.load %arg9[%c0_21, %c0_22] : memref<32x1xf32, #tpu.memory_space<vmem>>, vector<32x1xf32>
    tpu.vector_store %arg9[%c0_21, %c0_22], %40 {strides = array<i32>} : memref<32x1xf32, #tpu.memory_space<vmem>>, vector<32x1xf32>,
    %c0_23 = arith.constant 0 : index
    %c0_24 = arith.constant 0 : index
    %42 = vector.load %arg8[%c0_23, %c0_24] : memref<32x1xf32, #tpu.memory_space<vmem>>, vector<32x1xf32>
    tpu.vector_store %arg8[%c0_23, %c0_24], %30 {strides = array<i32>} : memref<32x1xf32, #tpu.memory_space<vmem>>, vector<32x1xf32>,
    %c3_i32 = arith.constant 3 : i32
    %43 = arith.cmpi eq, %arg1, %c3_i32 : i32
    %44 = arith.extui %43 : i1 to i32
    %c0_i32_25 = arith.constant 0 : i32
    %45 = arith.cmpi ne, %44, %c0_i32_25 : i32
    scf.if %45 {
      %c0_26 = arith.constant 0 : index
      %c0_27 = arith.constant 0 : index
      %46 = vector.load %arg8[%c0_26, %c0_27] : memref<32x1xf32, #tpu.memory_space<vmem>>, vector<32x1xf32>
      %c0_28 = arith.constant 0 : index
      %c0_29 = arith.constant 0 : index
      %47 = vector.load %arg9[%c0_28, %c0_29] : memref<32x1xf32, #tpu.memory_space<vmem>>, vector<32x1xf32>
      %48 = math.log %47 : vector<32x1xf32>
      %49 = arith.addf %46, %48 : vector<32x1xf32>
      %c0_30 = arith.constant 0 : index
      %c0_31 = arith.constant 0 : index
      %50 = vector.load %arg10[%c0_30, %c0_31] : memref<32x1xf32, #tpu.memory_space<vmem>>, vector<32x1xf32>
      %51 = arith.subf %49, %50 : vector<32x1xf32>
      %cst_32 = arith.constant 0.000000e+00 : f32
      %52 = vector.broadcast %cst_32 : f32 to vector<32x1xf32>
      %53 = arith.select %10, %51, %52 : vector<32x1xi1>, vector<32x1xf32>
      %54 = vector.shape_cast %53 : vector<32x1xf32> to vector<1x32x1xf32>
      %cst_33 = arith.constant dense<0.000000e+00> : vector<1xf32>
      %55 = vector.multi_reduction <add>, %54, %cst_33 [1, 2] : vector<1x32x1xf32> to vector<1xf32>
      %56 = vector.shape_cast %55 : vector<1xf32> to vector<1x1x1xf32>
      %57 = vector.extract %56[0, 0, 0] : f32 from vector<1x1x1xf32>
      %58 = arith.extui %10 : vector<32x1xi1> to vector<32x1xi32>
      %59 = arith.sitofp %58 : vector<32x1xi32> to vector<32x1xf32>
      %60 = vector.shape_cast %59 : vector<32x1xf32> to vector<1x32x1xf32>
      %cst_34 = arith.constant dense<0.000000e+00> : vector<1xf32>
      %61 = vector.multi_reduction <add>, %60, %cst_34 [1, 2] : vector<1x32x1xf32> to vector<1xf32>
      %62 = vector.shape_cast %61 : vector<1xf32> to vector<1x1x1xf32>
      %63 = vector.extract %62[0, 0, 0] : f32 from vector<1x1x1xf32>
      %64 = vector.broadcast %57 : f32 to vector<1x8x128xf32>
      %c0_35 = arith.constant 0 : index
      %c0_36 = arith.constant 0 : index
      %c0_37 = arith.constant 0 : index
      %65 = vector.load %arg6[%c0_35, %c0_36, %c0_37] : memref<1x8x128xf32, #tpu.memory_space<vmem>>, vector<1x8x128xf32>
      tpu.vector_store %arg6[%c0_35, %c0_36, %c0_37], %64 {strides = array<i32>} : memref<1x8x128xf32, #tpu.memory_space<vmem>>, vector<1x8x128xf32>,
      %66 = vector.broadcast %63 : f32 to vector<1x8x128xf32>
      %c0_38 = arith.constant 0 : index
      %c0_39 = arith.constant 0 : index
      %c0_40 = arith.constant 0 : index
      %67 = vector.load %arg7[%c0_38, %c0_39, %c0_40] : memref<1x8x128xf32, #tpu.memory_space<vmem>>, vector<1x8x128xf32>
      tpu.vector_store %arg7[%c0_38, %c0_39, %c0_40], %66 {strides = array<i32>} : memref<1x8x128xf32, #tpu.memory_space<vmem>>, vector<1x8x128xf32>,
    } else {
    }
    return
  }
  func.func @transform_0(%arg0: i32, %arg1: i32) -> (i32, i32) {
    %c0_i32 = arith.constant 0 : i32
    %c0_i32_0 = arith.constant 0 : i32
    return %arg0, %c0_i32 : i32, i32
  }
  func.func @transform_1(%arg0: i32, %arg1: i32) -> (i32, i32) {
    %c0_i32 = arith.constant 0 : i32
    %c0_i32_0 = arith.constant 0 : i32
    return %c0_i32, %arg1 : i32, i32
  }
  func.func @transform_2(%arg0: i32, %arg1: i32) -> (i32, i32) {
    %c0_i32 = arith.constant 0 : i32
    %c0_i32_0 = arith.constant 0 : i32
    return %arg0, %c0_i32 : i32, i32
  }
  func.func @transform_3(%arg0: i32, %arg1: i32) -> (i32, i32) {
    %c0_i32 = arith.constant 0 : i32
    return %arg0, %arg1 : i32, i32
  }
  func.func @transform_4(%arg0: i32, %arg1: i32) -> (i32, i32, i32) {
    %c0_i32 = arith.constant 0 : i32
    %c0_i32_0 = arith.constant 0 : i32
    %c0_i32_1 = arith.constant 0 : i32
    return %arg0, %c0_i32, %c0_i32_0 : i32, i32, i32
  }
  func.func @transform_5(%arg0: i32, %arg1: i32) -> (i32, i32, i32) {
    %c0_i32 = arith.constant 0 : i32
    %c0_i32_0 = arith.constant 0 : i32
    %c0_i32_1 = arith.constant 0 : i32
    return %arg0, %c0_i32, %c0_i32_0 : i32, i32, i32
  }
}

</mosaic_0001>

<bundles_post_ra>
// kernel: tpu_custom_call.1
= control target key start
LH: loop header
LB: loop body
LE: loop exit
PB: predicated region body
PF: predicated region fallthrough
CT: control target
= control target key end

     0   :  { %s2020_s0 = inlined_call_operand.vmem [shape: bf16[64,128], index: 0, kind: input, shape index: {}]   ;;  %s2021_s1 = inlined_call_operand.hbm [shape: bf16[128,512], index: 1, kind: input, shape index: {}]   ;;  %s2022_s2 = inlined_call_operand.vmem [shape: s32[64,1], index: 2, kind: input, shape index: {}]   ;;  %s2023_s3 = inlined_call_operand.hbm [shape: bf16[64,512], index: 3, kind: output, shape index: {0}]   ;;  %s2024_s4 = inlined_call_operand.hbm [shape: f32[2,8,128], index: 4, kind: output, shape index: {1}]   ;;  %s2025_s5 = inlined_call_operand.hbm [shape: f32[2,8,128], index: 5, kind: output, shape index: {2}]  }
   0x1   :  { %2038 = sst [smem:[#allocation26_spill]] %s2020_s0 }
   0x2   :  { %2039 = sst [smem:[#allocation27_spill]] %s2021_s1 }
   0x3   :  { %11 = vsyncpa [#allocation6], 0 }
   0x4   :  { %13 = vsyncpa [#allocation6 + $0x1], 0 }
   0x5   :  { %14 = vsyncpa [#allocation7], 0 }
   0x6   :  { %16 = vsyncpa [#allocation7 + $0x1], 0 }
   0x7   :  { %17 = vsyncpa [#allocation10], 0 }
   0x8   :  { %19 = vsyncpa [#allocation10 + $0x1], 0  ;;  %s1498_s18 = smov 0   ;;  %s1500_s19 = smov 0  }
   0x9   :  { %s1502_s20 = smov 0   ;;  %s1504_s21 = smov 0  }
   0xa   :  { %s1506_s22 = smov 0   ;;  %s1508_s23 = smov 0  }
   0xb   :  { %s1510_s24 = smov 0   ;;  %s1512_s25 = smov 0  }
   0xc   :  { %s1514_s26 = smov 0   ;;  %s1516_s27 = smov 0  }
   0xd   :  { %s1518_s28 = smov 0   ;;  %s1520_s29 = smov 0  }
   0xe   :  { %s1522_s30 = smov 0   ;;  %s1524_s6 = smov 0  }
   0xf LB: > { %2040 = sst [smem:[#allocation15_spill]] %s1420_s23  ;;  %s1567_s7 = sadd.s32 4294967295, %s1452_s6   ;;  %s1452_s6 = sphi %s1524_s6, %s25_s6   ;;  %s1448_s30 = sphi %s1522_s30, %s2079_s30   ;;  %s1444_s29 = sphi %s1520_s29, %s2085_s29   ;;  %s1440_s28 = sphi %s1518_s28, %s2077_s28   ;;  %s1436_s27 = sphi %s1516_s27, %s2076_s27   ;;  %s1432_s26 = sphi %s1514_s26, %s2075_s26   ;;  %s1428_s25 = sphi %s1512_s25, %s2074_s25   ;;  %s1424_s24 = sphi %s1510_s24, %s2073_s24   ;;  %s1420_s23 = sphi %s1508_s23, %s2072_s23   ;;  %s1416_s22 = sphi %s1506_s22, %s2084_s22   ;;  %s1412_s21 = sphi %s1504_s21, %s2083_s21   ;;  %s1408_s20 = sphi %s1502_s20, %s2082_s20   ;;  %s1404_s19 = sphi %s1500_s19, %s2081_s19   ;;  %s1400_s18 = sphi %s1498_s18, %s2080_s18  }
  0x10   : > { %2041 = sst [smem:[#allocation16_spill]] %s1428_s25  ;;  %s34_s9 = sadd.s32 1, %s1444_s29 }
  0x11   : > { %2042 = sst [smem:[#allocation17_spill]] %s1432_s26  ;;  %s37_s10 = sadd.s32 1, %s1448_s30 }
  0x12   : > { %2043 = sst [smem:[#allocation18_spill]] %s1444_s29  ;;  %p35_p0 = scmp.ge.s32.totalorder %s34_s9, 4 }
  0x13   : > { %2044 = sst [smem:[#allocation19_spill]] %s1448_s30  ;;  %s70_s11 = sadd.s32 1, %s1432_s26 }
  0x14   : > { %p77_p1 = scmp.ne.s32.totalorder %s1432_s26, %s1428_s25  ;;  %p78_p2 = scmp.eq.s32.totalorder %s1452_s6, 0 }
  0x15   : > { %s2087_s9 = smov (%p35_p0, %s34_s9), 0  ;;  %s2089_s10 = smov (!%p35_p0, %s37_s10), %s1448_s30 }
  0x16   : > { %2045 = sst [smem:[#allocation20_spill]] %s2087_s9  ;;  %s67_s12 = ssub.s32 %s1444_s29, %s2087_s9 }
  0x17   : > { %p1581_p3 = por %p78_p2, %p77_p1  ;;  %p39_p4 = scmp.ge.s32.totalorder %s2089_s10, 2 }
  0x18   : > { %p68_p5 = scmp.eq.s32.totalorder %s67_s12, 0  ;;  %p83_p6 = scmp.ne.s32.totalorder %s1428_s25, %s1424_s24 }
  0x19   : > { %p84_p7 = scmp.eq.s32.totalorder %s1567_s7, 0  ;;  %s2091_s10 = smov (%p39_p4, %s2089_s10), 0 }
  0x1a   : > { %2047 = sst [smem:[#allocation21_spill]] %s2091_s10  ;;  %s119_s16 = ssub.s32 %s1448_s30, %s2091_s10 }
  0x1b   : > { %s1590_s14 = scalar_select %p68_p5, %s1432_s26, %s70_s11  }
  0x1c   : > { %p1592_p8 = por %p84_p7, %p83_p6  ;;  %s121_s17 = sor.u32 %s119_s16, %s67_s12 }
  0x1d   : > { %2048 = sst [smem:[#allocation22_spill]] %s1590_s14  ;;  %s124_s24 = sadd.s32 1, %s1420_s23 }
  0x1e   : > { %p122_p9 = scmp.eq.s32.totalorder %s121_s17, 0  ;;  %p134_p10 = scmp.ne.s32.totalorder %s1420_s23, %s1416_s22 }
  0x1f   : > { %p135_p11 = scmp.eq.s32.totalorder %s1567_s7, 7  ;;  %p140_p12 = scmp.ne.s32.totalorder %s1416_s22, %s1412_s21 }
  0x20   : > { %s1605_s8 = scalar_select %p122_p9, %s1420_s23, %s124_s24  }
  0x21   : > { %p1607_p13 = por %p135_p11, %p134_p10  ;;  %s2052_s9 = sadd.s32 4294967294, %s1452_s6  }
  0x22   : > { %2050 = sst [smem:[#allocation23_spill]] %s1605_s8  ;;  %p141_p0 = scmp.eq.s32.totalorder %s2052_s9, 7 }
  0x23   : > { %s2051_s11 = scalar_select %p1607_p13, 1, 0 }
  0x24   : > { %p148_p1 = scmp.eq.s32.totalorder %s119_s16, 0  ;;  %s150_s10 = sadd.s32 1, %s1408_s20 }
  0x25   : > { %p1614_p2 = por %p141_p0, %p140_p12  ;;  %p160_p4 = scmp.ne.s32.totalorder %s1408_s20, %s1404_s19 }
  0x26   : > { %s1621_s17 = scalar_select %p148_p1, %s1408_s20, %s150_s10  }
  0x27   : > { %s2053_s12 = scalar_select %p1614_p2, 1, 0 }
  0x28   : > { %2055 = sst [smem:[#allocation25_spill]] %s1621_s17  ;;  %p1623_p5 = por %p160_p4, %p135_p11 }
  0x29   : > { %2054 = sst [smem:[#allocation24_spill]] %s2053_s12  ;;  %p166_p6 = scmp.ne.s32.totalorder %s1404_s19, %s1400_s18 }
  0x2a   : > { %s2056_s30 = scalar_select %p1623_p5, 1, 0 }
  0x2b   : > { %p1056_p7 = scmp.lt.s32.totalorder %s1452_s6, 8  ;;  %p1630_p9 = por %p166_p6, %p141_p0 }
  0x2c   : > { %s222_s9 = sand.u32 1, %s1432_s26   ;;  %s943_s14 = sshll.u32 %s1444_s29, 6 }
  0x2d   : > { %s2057_s24 = scalar_select %p1630_p9, 1, 0 }
  0x2e   : > { %s942_s16 = sshll.u32 %s222_s9, 6  ;;  %s2058_s1 = sld [smem:[#allocation27_spill]] }
  0x2f   : > { %s226_s10 = scalar_lea.vmem [#allocation5], %s942_s16  ;;  %p1645_p10 = pnand %p1056_p7, %p1581_p3 }
  0x30   : > { %s232_s17 = sshll.u32 %s226_s10, 4  ;;  %s1649_s29 = scalar_lea.sflag [#allocation6], %s222_s9  ;;  %s1641_s17 = int_to_ptr.vmem [resolvable:$true] %s232_s17 }
  0x31   : > { %p1218_p12 = pneg %p1645_p10 }
  0x34   : > { %s1639_s12 = scalar_lea.hbm %s2058_s1, %s943_s14  ;;  %s1221_s13 = scalar_lea.hbm %s2058_s1, 4096 }
  0x35   : > { %s1216_s23 = scalar_lea.hbm %s1639_s12, 1024  ;;  %p1222_p3 = scmp.lt.u32.totalorder %s1639_s12, %s2058_s1 }
  0x36   : > { %p1217_p11 = scmp.ne.s32.totalorder %s1639_s12, %s1216_s23  ;;  %p1223_p4 = scmp.lt.u32.totalorder %s1221_s13, %s1216_s23 }
  0x37   : > { %p1225_p7 = scmp.lt.u32.totalorder %s1216_s23, %s1639_s12 }
  0x38   : > { %p1219_p0 = pnand %p1218_p12, %p1217_p11  ;;  %p1224_p6 = por %p1223_p4, %p1222_p3 }
  0x3a   : > { %p1220_p1 = pneg %p1219_p0  ;;  %p1226_p9 = por %p1225_p7, %p1224_p6 }
  0x3c   : > { %p1227_p2 = pnand %p1226_p9, %p1220_p1 }
  0x3e   : > { %1230 = shalt.err (!%p1227_p2)
}
  0x3f   : > { %s1231_s9 = scalar_lea.vmem %s1641_s17, 1024  ;;  %s1454_s8 = smov [#allocation5]  }
  0x40   : > { %p1232_p11 = scmp.ne.s32.totalorder %s1641_s17, %s1231_s9  ;;  %s1236_s14 = sshll.u32 %s1454_s8, 4  ;;  %s1237_s14 = int_to_ptr.vmem [resolvable:$false] %s1236_s14 }
  0x41   : > { %s1238_s16 = scalar_lea.vmem %s1237_s14, 2048  ;;  %p1239_p5 = scmp.lt.s32.totalorder %s1641_s17, %s1237_s14 }
  0x42   : > { %p1234_p0 = pnand %p1232_p11, %p1218_p12  ;;  %p1240_p3 = scmp.lt.s32.totalorder %s1238_s16, %s1231_s9 }
  0x44   : > { %p1235_p13 = pneg %p1234_p0  ;;  %p1241_p4 = por %p1240_p3, %p1239_p5 }
  0x46   : > { %p1242_p6 = pnand %p1241_p4, %p1235_p13 }
  0x48   : > { %1245 = shalt.err (!%p1242_p6)
}
  0x49   : > { %s1455_s23 = smov 256   ;;  %s1456_s13 = smov 64  }
  0x4a   : > { %s1457_s10 = smov 4   ;;  %p944_p2 = scmp.ge.s32.totalorder %s1452_s6, 1 }
  0x4b   : > { %1045 = dma.hbm_to_vmem [thread:$0]  (!%p1645_p10), %s1639_s12, 1024, %s1641_s17, %s1649_s29, %s1455_s23, %s1456_s13, %s1457_s10  }
  0x4c   : > { %p249_p9 = scmp.lt.s32.totalorder %s1452_s6, 9 }
  0x4e   : > { %p250_p12 = pnand %p944_p2, %p249_p9 }
  0x4f   : > { %s255_s9 = sand.u32 (!%p250_p12), 1, %s1428_s25  }
  0x50   : > { %253 = sbr.rel (%p250_p12) target bundleno = 1114 (0x45a), region = 32  ;;  %s945_s8 = sshll.u32 (!%p250_p12), %s255_s9, 6 }
  0x51   : > { %s256_s14 = scalar_lea.sflag (!%p250_p12), [#allocation6], %s255_s9  ;;  %s1680_s16 = scalar_lea.vmem (!%p250_p12), [#allocation5], %s945_s8 }
  0x57   : > { %1387 = dma.done.wait (%p1592_p8), %s256_s14, 1024  }
  0x58   : > { %1389 = vsyncadd (%p1592_p8), %s256_s14, 4294966272  ;;  %s2035_s29 = sand.u32 1, %s1416_s22   ;;  %s296_s12 = sand.u32 1, %s1404_s19  }
  0x59   : > { %s946_s17 = sshll.u32 %s2035_s29, 4  ;;  %s1690_s18 = sshll.u32 %s296_s12, 3 }
  0x5a   : > { %s949_s23 = sshll.u32 %s1440_s28, 2  ;;  %s2060_s0 = sld [smem:[#allocation26_spill]] }
  0x5b   : > { %p307_p13 = scmp.lt.s32.totalorder %s949_s23, 7  ;;  %s1703_s29 = scalar_lea.vmem [#allocation8], %s946_s17 }
  0x5c   : > { %s298_s12 = scalar_lea.vmem [#allocation9], %s1690_s18  ;;  %s2037_s25 = scalar_lea.vmem [#allocation11], %s1690_s18 }
  0x5d   : > { %s2093_s23 = smov (!%p307_p13, %s949_s23), 7  ;;  %p953_p8 = scmp.ne.s32.totalorder %s1436_s27, 0 }
  0x5e   : > { %s950_s13 = sshll.u32 %s2093_s23, 2  ;;  %s952_s10 = sshll.u32 %s2093_s23, 3  ;;  %vm324_vm0 = vcmask (!%p953_p8), 7168   ;;  %v1458_v0 = vmov (!%p953_p8), -inf   ;;  %v1459_v1 = vmov (!%p953_p8), 0.0  }
  0x5f   : > { %s1701_s26 = scalar_lea.vmem %s2022_s2, %s952_s10  ;;  %323 = sbr.rel (%p953_p8) target bundleno = 102 (0x66), region = 40  ;;  %325 = vst.msk [vmem:[#allocation2] sm:$0xff] (!%p953_p8), %vm324_vm0, %v1458_v0  ;;  %326 = vst.msk [vmem:[#allocation2 + $0x8] sm:$0xff] (!%p953_p8), %vm324_vm0, %v1458_v0 }
  0x60   : > { %s1696_s8 = scalar_lea.vmem %s2060_s0, %s950_s13  ;;  %327 = vst.msk [vmem:[#allocation2 + $0x10] sm:$0xff] (!%p953_p8), %vm324_vm0, %v1458_v0  ;;  %328 = vst.msk [vmem:[#allocation2 + $0x18] sm:$0xff] (!%p953_p8), %vm324_vm0, %v1458_v0 }
  0x61   : > { %329 = vst.msk [vmem:[#allocation3] sm:$0xff] (!%p953_p8), %vm324_vm0, %v1459_v1  ;;  %330 = vst.msk [vmem:[#allocation3 + $0x8] sm:$0xff] (!%p953_p8), %vm324_vm0, %v1459_v1 }
  0x62   : > { %331 = vst.msk [vmem:[#allocation3 + $0x10] sm:$0xff] (!%p953_p8), %vm324_vm0, %v1459_v1  ;;  %332 = vst.msk [vmem:[#allocation3 + $0x18] sm:$0xff] (!%p953_p8), %vm324_vm0, %v1459_v1 }
  0x63   : > { %333 = vst.msk [vmem:[#allocation4] sm:$0xff] (!%p953_p8), %vm324_vm0, %v1459_v1  ;;  %334 = vst.msk [vmem:[#allocation4 + $0x8] sm:$0xff] (!%p953_p8), %vm324_vm0, %v1459_v1 }
  0x64   : > { %335 = vst.msk [vmem:[#allocation4 + $0x10] sm:$0xff] (!%p953_p8), %vm324_vm0, %v1459_v1  ;;  %336 = vst.msk [vmem:[#allocation4 + $0x18] sm:$0xff] (!%p953_p8), %vm324_vm0, %v1459_v1 }
  0x66 PF: > { %v1182_v2 = vld [vmem:[%s1680_s16] sm:$0xff]   ;;  %v1183_v3 = vld [vmem:[%s1680_s16 + $0x8] sm:$0xff]   ;;  %v1184_v4 = vld [vmem:[%s1680_s16 + $0x10] sm:$0xff]   ;;  %v1460_v18 = vmov 0   ;;  %vm542_vm1 = vcmask 7168   ;;  %s968_s1 = sshll.u32 %s1436_s27, 7  ;;  %v498_v51 = vlaneseq }
  0x67   : > { %1010 = vmatprep.subr.bf16.mxu0 %v1182_v2  ;;  %v1185_v5 = vld [vmem:[%s1680_s16 + $0x18] sm:$0xff]   ;;  %v1190_v6 = vld [vmem:[%s1696_s8] sm:$0xff]   ;;  %v1187_v8 = vld [vmem:[%s1680_s16 + $0x28] sm:$0xff]   ;;  %1181 = vset.pattern.permute.xlu1 %v1460_v18  ;;  %v501_v38 = vstv %s968_s1  ;;  %p969_p5 = scmp.ne.s32.totalorder %s1436_s27, 3 }
  0x68   : > { %1011 = vmatpush3.bf16.msra.mxu0 %v1182_v2  ;;  %1026 = vmatprep.mubr.bf16.mxu0 %v1190_v6  ;;  %v1186_v7 = vld [vmem:[%s1680_s16 + $0x20] sm:$0xff]   ;;  %v1188_v9 = vld [vmem:[%s1680_s16 + $0x30] sm:$0xff]   ;;  %v1189_v10 = vld [vmem:[%s1680_s16 + $0x38] sm:$0xff]   ;;  %v499_v54 = vand.u32 127, %v498_v51 }
  0x69   : > { %1012 = vmatprep.subr.bf16.mxu0 %v1183_v3  ;;  %v1191_v11 = vld [vmem:[%s1696_s8 + $0x8] sm:$0xff]   ;;  %1180 = vset.pattern.permute.xlu0 %v1460_v18  ;;  %v1736_v19 = vld [vmem:[#allocation2 + $0x10] sm:$0xff]  ;;  %v1738_v20 = vld [vmem:[#allocation2] sm:$0xff] }
  0x6a   : > { %v1746_v25 = vld [vmem:[#allocation2 + $0x18] sm:$0xff]  ;;  %v1749_v26 = vld [vmem:[%s1701_s26] sm:$0xff]  ;;  %v1756_v28 = vld [vmem:[#allocation2 + $0x8] sm:$0xff] }
  0x6b   : > { %vm490_vm2 = vcmp.ne.s32.totalorder %v1749_v26, 4294967196  ;;  %v1772_v34 = vld [vmem:[%s1701_s26 + $0x8] sm:$0xff]  ;;  %v1788_v39 = vld [vmem:[%s1701_s26 + $0x10] sm:$0xff]  ;;  %v1796_v42 = vld [vmem:[%s1701_s26 + $0x18] sm:$0xff] }
  0x6c   : > { %1013 = vmatpush3.bf16.msra.mxu0 %v1183_v3  ;;  %v494_v37 = vsel %vm490_vm2, %v1749_v26, 0  ;;  %vm491_vm3 = vcmp.ne.s32.totalorder %v1772_v34, 4294967196  ;;  %vm492_vm4 = vcmp.ne.s32.totalorder %v1788_v39, 4294967196  ;;  %vm493_vm5 = vcmp.ne.s32.totalorder %v1796_v42, 4294967196 }
  0x6d   : > { %1014 = vmatprep.subr.bf16.mxu0 %v1184_v4  ;;  %v502_v40 = vsub.s32 %v494_v37, %v501_v38  ;;  %v495_v41 = vsel %vm491_vm3, %v1772_v34, 0  ;;  %v496_v44 = vsel %vm492_vm4, %v1788_v39, 0  ;;  %v497_v46 = vsel %vm493_vm5, %v1796_v42, 0 }
  0x6e   : > { %v503_v43 = vsub.s32 %v495_v41, %v501_v38  ;;  %v504_v45 = vsub.s32 %v496_v44, %v501_v38  ;;  %v505_v47 = vsub.s32 %v497_v46, %v501_v38  ;;  %v610_v44 = vld [vmem:[#allocation3 + $0x18] sm:$0xff] }
  0x70   : > { %1015 = vmatpush3.bf16.msra.mxu0 %v1184_v4 }
  0x71   : > { %1016 = vmatprep.subr.bf16.mxu0 %v1185_v5 }
  0x74   : > { %1017 = vmatpush3.bf16.msra.mxu0 %v1185_v5 }
  0x75   : > { %1018 = vmatprep.subr.bf16.mxu0 %v1186_v7 }
  0x78   : > { %1019 = vmatpush3.bf16.msra.mxu0 %v1186_v7 }
  0x79   : > { %1020 = vmatprep.subr.bf16.mxu0 %v1187_v8 }
  0x7c   : > { %1021 = vmatpush3.bf16.msra.mxu0 %v1187_v8 }
  0x7d   : > { %1022 = vmatprep.subr.bf16.mxu0 %v1188_v9 }
  0x80   : > { %1023 = vmatpush3.bf16.msra.mxu0 %v1188_v9 }
  0x81   : > { %1024 = vmatprep.subr.bf16.mxu0 %v1189_v10 }
  0x84   : > { %1025 = vmatpush3.bf16.msra.mxu0 %v1189_v10 }
  0x87   : > { %1027 = vmatmul.mubr.bf16.vlgmr.msra.gmra.mrb[0].mxu0 %v1191_v11 }
 0x15a   : > { %v1718_v12 = vpop.f32.mrb[0].mxu0 }
 0x15b   : > { %555 = vmax.xlane.f32.xlu1 %v1718_v12  ;;  %v1721_v13 = vpop.f32.mrb[1].mxu0 }
 0x15c   : > { %551 = vmax.xlane.f32.xlu0 %v1721_v13  ;;  %v1724_v14 = vpop.f32.mrb[2].mxu0 }
 0x15d   : > { %v997_v15 = vpack.c.bf16 %v1724_v14, %v1718_v12  ;;  %v1728_v16 = vpop.f32.mrb[3].mxu0 }
 0x15e   : > { %v992_v17 = vpack.c.bf16 %v1728_v16, %v1721_v13 }
 0x15f   : > { %999 = vst [vmem:[%s1703_s29 + $0x8] sm:$0xff] %v997_v15   ;;  %557 = vmax.xlane.f32.xlu1 %v1724_v14 }
 0x160   : > { %993 = vst [vmem:[%s1703_s29] sm:$0xff] %v992_v17   ;;  %553 = vmax.xlane.f32.xlu0 %v1728_v16  ;;  %v523_v17 = vld [vmem:[#allocation4 + $0x8] sm:$0xff] }
 0x1e8   : > { %v556_v21 = vpop.xlane.xlu1 %555 }
 0x1e9   : > { %v1741_v22 = vmax.f32 %v1736_v19, %v556_v21  ;;  %v552_v23 = vpop.xlane.xlu0 %551 }
 0x1ea   : > { %v1744_v24 = vmax.f32 %v1738_v20, %v552_v23  ;;  %v607_v23 = vld [vmem:[#allocation3] sm:$0xff] }
 0x1eb   : > { %v597_v27 = vsub.f32 %v1736_v19, %v1741_v22  ;;  %633 = vst.msk [vmem:[#allocation2 + $0x10] sm:$0xff] %vm542_vm1, %v1741_v22  ;;  %575 = vperm.xlu1 %1181, %v1741_v22  }
 0x1ec   : > { %v595_v29 = vsub.f32 %v1738_v20, %v1744_v24  ;;  %631 = vst.msk [vmem:[#allocation2] sm:$0xff] %vm542_vm1, %v1744_v24  ;;  %v558_v30 = vpop.xlane.xlu1 %557  ;;  %565 = vperm.xlu0 %1180, %v1744_v24   ;;  %v524_v20 = vld [vmem:[#allocation4 + $0x10] sm:$0xff] }
 0x1ed   : > { %v1764_v31 = vmax.f32 %v1746_v25, %v558_v30  ;;  %v554_v32 = vpop.xlane.xlu0 %553  ;;  %v603_v11 = vmul.f32 1.442695, %v597_v27  ;;  %v525_v27 = vld [vmem:[#allocation4 + $0x18] sm:$0xff] }
 0x1ee   : > { %v1769_v33 = vmax.f32 %v1756_v28, %v554_v32  ;;  %v599_v10 = vmul.f32 1.442695, %v595_v29  ;;  %v608_v32 = vld [vmem:[#allocation3 + $0x8] sm:$0xff] }
 0x1ef   : > { %v598_v35 = vsub.f32 %v1746_v25, %v1764_v31  ;;  %634 = vst.msk [vmem:[#allocation2 + $0x18] sm:$0xff] %vm542_vm1, %v1764_v31  ;;  %580 = vperm.xlu1 %1181, %v1764_v31  }
 0x1f0   : > { %v596_v36 = vsub.f32 %v1756_v28, %v1769_v33  ;;  %632 = vst.msk [vmem:[#allocation2 + $0x8] sm:$0xff] %vm542_vm1, %v1769_v33 }
 0x1f3   : > { %570 = vperm.xlu1 %1181, %v1769_v33   ;;  %v609_v33 = vld [vmem:[#allocation3 + $0x10] sm:$0xff] }
 0x1f7   : > { %507 = vperm.xlu1 %1181, %v502_v40  }
 0x1fb   : > { %510 = vperm.xlu1 %1181, %v503_v43  }
 0x1ff   : > { %513 = vperm.xlu1 %1181, %v504_v45  }
 0x203   : > { %516 = vperm.xlu1 %1181, %v505_v47  }
 0x26a   : > { %v576_v48 = vpop.permute.xlu1 %575 }
 0x26b   : > { %v566_v50 = vpop.permute.xlu0 %565  ;;  %v585_v55 = vsub.f32 %v1718_v12, %v576_v48 }
 0x26c   : > { %v583_v52 = vsub.f32 %v1721_v13, %v566_v50 }
 0x26d   : > { %v591_v60 = vmul.f32 1.442695, %v585_v55  ;;  %v639_v55 = vld [vmem:[#allocation2] sm:$0xff] (!%p969_p5) }
 0x26e   : > { %v581_v49 = vpop.permute.xlu1 %580  ;;  %v587_v56 = vmul.f32 1.442695, %v583_v52 }
 0x26f   : > { %v586_v61 = vsub.f32 %v1724_v14, %v581_v49 }
 0x270   : > { %1192 = vpow2.f32 %v587_v56 }
 0x271   : > { %1194 = vpow2.f32 %v591_v60  ;;  %v593_v1 = vmul.f32 1.442695, %v586_v61  ;;  %v641_v60 = vld [vmem:[#allocation2 + $0x10] sm:$0xff] (!%p969_p5) }
 0x272   : > { %v571_v53 = vpop.permute.xlu1 %570 }
 0x273   : > { %v584_v57 = vsub.f32 %v1728_v16, %v571_v53 }
 0x275   : > { %v589_v62 = vmul.f32 1.442695, %v584_v57  ;;  %v640_v57 = vld [vmem:[#allocation2 + $0x8] sm:$0xff] (!%p969_p5) }
 0x276   : > { %v508_v58 = vpop.permute.xlu1 %507 }
 0x277   : > { %vm518_vm6 = vcmp.eq.s32.totalorder %v499_v54, %v508_v58  ;;  %1196 = vpow2.f32 %v589_v62 }
 0x278   : > { %v526_v59 = vsel %vm518_vm6, %v1721_v13, 0.0  ;;  %1198 = vpow2.f32 %v593_v1  ;;  %v522_v13 = vld [vmem:[#allocation4] sm:$0xff] }
 0x279   : > { %530 = vadd.xlane.f32.xlu1 %v526_v59  ;;  %1200 = vpow2.f32 %v599_v10 }
 0x27a   : > { %v511_v63 = vpop.permute.xlu1 %510  ;;  %v1193_v5 = vpop.eup %1192  ;;  %1202 = vpow2.f32 %v603_v11 }
 0x27b   : > { %vm519_vm7 = vcmp.eq.s32.totalorder %v499_v54, %v511_v63  ;;  %v1195_v7 = vpop.eup %1194  ;;  %v1461_v63 = vmov (!%p969_p5), 0.0  }
 0x27c   : > { %v527_v0 = vsel %vm519_vm7, %v1728_v16, 0.0  ;;  %v605_v16 = vmul.f32 1.442695, %v598_v35  ;;  %v971_v1 = vsel (!%p969_p5), %vm491_vm3, 1.0, %v1461_v63  ;;  %v973_v34 = vsel (!%p969_p5), %vm493_vm5, 1.0, %v1461_v63 }
 0x27d   : > { %532 = vadd.xlane.f32.xlu0 %v527_v0  ;;  %v970_v0 = vsel (!%p969_p5), %vm490_vm2, 1.0, %v1461_v63  ;;  %v700_v39 = vsel (!%p969_p5), %vm542_vm1, %v973_v34, 0.0 }
 0x27e   : > { %v514_v2 = vpop.permute.xlu1 %513 }
 0x27f   : > { %vm520_vm8 = vcmp.eq.s32.totalorder %v499_v54, %v514_v2 }
 0x280   : > { %v528_v3 = vsel %vm520_vm8, %v1718_v12, 0.0  ;;  %v601_v12 = vmul.f32 1.442695, %v596_v36 }
 0x281   : > { %534 = vadd.xlane.f32.xlu0 %v528_v3  ;;  %v1197_v8 = vpop.eup %1196  ;;  %v642_v3 = vld [vmem:[#allocation2 + $0x18] sm:$0xff] (!%p969_p5) }
 0x282   : > { %v517_v4 = vpop.permute.xlu1 %516  ;;  %v1199_v9 = vpop.eup %1198  ;;  %1204 = vpow2.f32 %v601_v12 }
 0x283   : > { %vm521_vm9 = vcmp.eq.s32.totalorder %v499_v54, %v517_v4  ;;  %1206 = vpow2.f32 %v605_v16  ;;  %v1201_v21 = vpop.eup %1200 }
 0x284   : > { %v529_v6 = vsel %vm521_vm9, %v1724_v14, 0.0  ;;  %v1203_v28 = vpop.eup %1202  ;;  %v611_v25 = vmul.f32 %v1201_v21, %v607_v23 }
 0x285   : > { %536 = vadd.xlane.f32.xlu1 %v529_v6  ;;  %615 = vadd.xlane.f32.xlu0 %v1193_v5  ;;  %v613_v38 = vmul.f32 %v1203_v28, %v609_v33 }
 0x289   : > { %617 = vadd.xlane.f32.xlu1 %v1197_v8  ;;  %619 = vadd.xlane.f32.xlu0 %v1195_v7 }
 0x28c   : > { %v1205_v29 = vpop.eup %1204 }
 0x28d   : > { %621 = vadd.xlane.f32.xlu1 %v1199_v9  ;;  %v612_v37 = vmul.f32 %v1205_v29, %v608_v32  ;;  %v1207_v40 = vpop.eup %1206 }
 0x28e   : > { %v614_v47 = vmul.f32 %v1207_v40, %v610_v44 }
 0x306   : > { %v531_v14 = vpop.xlane.xlu1 %530 }
 0x307   : > { %v538_v15 = vadd.f32 %v531_v14, %v522_v13  ;;  %v695_v13 = vsel (!%p969_p5), %vm542_vm1, %v970_v0, 0.0  ;;  %v696_v14 = vsel (!%p969_p5), %vm542_vm1, %v971_v1, 0.0 }
 0x308   : > { %v697_v23 = vadd.f32 (!%p969_p5), %v696_v14, %v695_v13 }
 0x309   : > { %543 = vst.msk [vmem:[#allocation4] sm:$0xff] %vm542_vm1, %v538_v15 }
 0x30a   : > { %v533_v18 = vpop.xlane.xlu0 %532 }
 0x30b   : > { %v539_v19 = vadd.f32 %v533_v18, %v523_v17  ;;  %v972_v17 = vsel (!%p969_p5), %vm492_vm4, 1.0, %v1461_v63 }
 0x30c   : > { %v698_v28 = vsel (!%p969_p5), %vm542_vm1, %v972_v17, 0.0 }
 0x30d   : > { %544 = vst.msk [vmem:[#allocation4 + $0x8] sm:$0xff] %vm542_vm1, %v539_v19  ;;  %v699_v32 = vadd.f32 (!%p969_p5), %v698_v28, %v697_v23 }
 0x30e   : > { %v535_v22 = vpop.xlane.xlu0 %534 }
 0x30f   : > { %v540_v24 = vadd.f32 %v535_v22, %v524_v20 }
 0x310   : > { %v659_v62 = vld [vmem:[#allocation4] sm:$0xff] (!%p969_p5) }
 0x311   : > { %545 = vst.msk [vmem:[#allocation4 + $0x10] sm:$0xff] %vm542_vm1, %v540_v24 }
 0x312   : > { %v537_v30 = vpop.xlane.xlu1 %536  ;;  %v616_v31 = vpop.xlane.xlu0 %615 }
 0x313   : > { %v541_v35 = vadd.f32 %v537_v30, %v525_v27  ;;  %v623_v36 = vadd.f32 %v616_v31, %v611_v25 }
 0x314   : > { %v660_v6 = vld [vmem:[#allocation4 + $0x8] sm:$0xff] (!%p969_p5) }
 0x315   : > { %546 = vst.msk [vmem:[#allocation4 + $0x18] sm:$0xff] %vm542_vm1, %v541_v35  ;;  %627 = vst.msk [vmem:[#allocation3] sm:$0xff] %vm542_vm1, %v623_v36  ;;  %v701_v35 = vadd.f32 (!%p969_p5), %v700_v39, %v699_v32 }
 0x316   : > { %v618_v41 = vpop.xlane.xlu1 %617  ;;  %v620_v43 = vpop.xlane.xlu0 %619 }
 0x317   : > { %v624_v45 = vadd.f32 %v618_v41, %v612_v37  ;;  %v625_v46 = vadd.f32 %v620_v43, %v613_v38  ;;  %638 = sbr.rel (%p969_p5) target bundleno = 1036 (0x40c), region = 44 }
 0x318   : > { %v661_v9 = vld [vmem:[#allocation4 + $0x10] sm:$0xff] (!%p969_p5) }
 0x319   : > { %628 = vst.msk [vmem:[#allocation3 + $0x8] sm:$0xff] %vm542_vm1, %v624_v45  ;;  %629 = vst.msk [vmem:[#allocation3 + $0x10] sm:$0xff] %vm542_vm1, %v625_v46 }
 0x31a   : > { %v622_v48 = vpop.xlane.xlu1 %621 }
 0x31b   : > { %v626_v49 = vadd.f32 %v622_v48, %v614_v47 }
 0x31c   : > { %v643_v50 = vld [vmem:[#allocation3] sm:$0xff] (!%p969_p5)  ;;  %v662_v11 = vld [vmem:[#allocation4 + $0x18] sm:$0xff] (!%p969_p5) }
 0x31d   : > { %630 = vst.msk [vmem:[#allocation3 + $0x18] sm:$0xff] %vm542_vm1, %v626_v49  ;;  %1208 = vlog2.f32 (!%p969_p5), %v643_v50 }
 0x320   : > { %v644_v51 = vld [vmem:[#allocation3 + $0x8] sm:$0xff]  ;;  %v645_v52 = vld [vmem:[#allocation3 + $0x10] sm:$0xff] }
 0x321   : > { %1210 = vlog2.f32 %v644_v51 }
 0x322   : > { %1212 = vlog2.f32 %v645_v52 }
 0x324   : > { %v646_v53 = vld [vmem:[#allocation3 + $0x18] sm:$0xff] }
 0x325   : > { %1214 = vlog2.f32 %v646_v53 }
 0x327   : > { %v1209_v54 = vpop.eup %1208 }
 0x328   : > { %v648_v58 = vmul.f32 0.6931472, %v1209_v54 }
 0x32a   : > { %v655_v5 = vadd.f32 %v648_v58, %v639_v55 }
 0x32b   : > { %v1211_v56 = vpop.eup %1210 }
 0x32c   : > { %v1213_v59 = vpop.eup %1212  ;;  %v650_v61 = vmul.f32 0.6931472, %v1211_v56  ;;  %v663_v12 = vsub.f32 %v655_v5, %v659_v62 }
 0x32d   : > { %v652_v4 = vmul.f32 0.6931472, %v1213_v59 }
 0x32e   : > { %v656_v8 = vadd.f32 %v650_v61, %v640_v57  ;;  %v667_v19 = vsel %vm490_vm2, %v663_v12, 0.0 }
 0x32f   : > { %v1215_v2 = vpop.eup %1214  ;;  %v657_v10 = vadd.f32 %v652_v4, %v641_v60  ;;  %v671_v22 = vsel %vm542_vm1, %v667_v19, 0.0 }
 0x330   : > { %v654_v7 = vmul.f32 0.6931472, %v1215_v2  ;;  %v664_v16 = vsub.f32 %v656_v8, %v660_v6 }
 0x331   : > { %v665_v18 = vsub.f32 %v657_v10, %v661_v9 }
 0x332   : > { %v658_v15 = vadd.f32 %v654_v7, %v642_v3  ;;  %v668_v21 = vsel %vm491_vm3, %v664_v16, 0.0 }
 0x333   : > { %v669_v24 = vsel %vm492_vm4, %v665_v18, 0.0  ;;  %v672_v27 = vsel %vm542_vm1, %v668_v21, 0.0 }
 0x334   : > { %v666_v20 = vsub.f32 %v658_v15, %v662_v11  ;;  %v673_v29 = vadd.f32 %v672_v27, %v671_v22  ;;  %v674_v26 = vsel %vm542_vm1, %v669_v24, 0.0 }
 0x336   : > { %v670_v25 = vsel %vm493_vm5, %v666_v20, 0.0  ;;  %v675_v31 = vadd.f32 %v674_v26, %v673_v29 }
 0x337   : > { %v676_v30 = vsel %vm542_vm1, %v670_v25, 0.0 }
 0x338   : > { %v677_v33 = vadd.f32 %v676_v30, %v675_v31 }
 0x33a   : > { %678 = vadd.xlane.f32.xlu0 %v677_v33 }
 0x33e   : > { %702 = vadd.xlane.f32.xlu0 %v701_v35 }
 0x3c7   : > { %v679_v36 = vpop.xlane.xlu0 %678 }
 0x3c8   : > { %v680_v37 = vrot.slane %v679_v36, 4 }
 0x3ca   : > { %v681_v38 = vadd.f32 %v680_v37, %v679_v36 }
 0x3cb   : > { %v703_v40 = vpop.xlane.xlu0 %702 }
 0x3cc   : > { %v682_v41 = vrot.slane %v681_v38, 2  ;;  %v704_v43 = vrot.slane %v703_v40, 4 }
 0x3ce   : > { %v705_v42 = vadd.f32 %v704_v43, %v703_v40  ;;  %v683_v44 = vadd.f32 %v682_v41, %v681_v38 }
 0x3d0   : > { %v706_v45 = vrot.slane %v705_v42, 2  ;;  %v684_v46 = vrot.slane %v683_v44, 1 }
 0x3d2   : > { %v707_v47 = vadd.f32 %v706_v45, %v705_v42  ;;  %v685_v48 = vadd.f32 %v684_v46, %v683_v44 }
 0x3d4   : > { %1030 = vpush %v685_v48  ;;  %v708_v49 = vrot.slane %v707_v47, 1 }
 0x3d6   : > { %v709_v50 = vadd.f32 %v708_v49, %v707_v47 }
 0x3d8   : > { %1032 = vpush %v709_v50 }
 0x405   : > { %s1031_s26 = spop %1030 }
 0x406   : > { %v711_v51 = vstv %s1031_s26 }
 0x407   : > { %712 = vst [vmem:[%s298_s12] sm:$0xff] %v711_v51 }
 0x409   : > { %s1033_s16 = spop %1032 }
 0x40a   : > { %v713_v52 = vstv %s1033_s16 }
 0x40b   : > { %714 = vst [vmem:[%s2037_s25] sm:$0xff] %v713_v52 }
 0x40c PF: > { %s720_s17 = sand.u32 1, %s1567_s7   ;;  %s980_s23 = sshll.u32 %s1440_s28, 7 }
 0x40d   : > { %s1869_s9 = scalar_lea.hbm %s2024_s4, %s980_s23  ;;  %s757_s15 = sshll.u32 %s298_s12, 4  ;;  %s1873_s15 = int_to_ptr.vmem [resolvable:$true] %s757_s15 }
 0x40e   : > { %s988_s8 = sshll.u32 %s1440_s28, 4  ;;  %s1876_s14 = scalar_lea.sflag [#allocation10], %s720_s17 }
 0x40f   : > { %s1246_s1 = scalar_lea.vmem %s1873_s15, 128  ;;  %p2061_p1 = scmp.ne.s32.totalorder %s2056_s30, 0 }
 0x410   : > { %p1247_p10 = scmp.ne.s32.totalorder %s1873_s15, %s1246_s1  ;;  %s1462_s7 = smov [#allocation9]  }
 0x411   : > { %s1250_s26 = sshll.u32 %s1462_s7, 4  ;;  %s1251_s26 = int_to_ptr.vmem [resolvable:$false] %s1250_s26 }
 0x412   : > { %p1248_p7 = pnand %p1247_p10, %p2061_p1  ;;  %s1252_s16 = scalar_lea.vmem %s1251_s26, 256 }
 0x413   : > { %p1253_p0 = scmp.lt.s32.totalorder %s1873_s15, %s1251_s26  ;;  %p1254_p3 = scmp.lt.s32.totalorder %s1252_s16, %s1246_s1 }
 0x414   : > { %p1249_p11 = pneg %p1248_p7 }
 0x415   : > { %p1255_p4 = por %p1254_p3, %p1253_p0 }
 0x417   : > { %p1256_p6 = pnand %p1255_p4, %p1249_p11 }
 0x419   : > { %1259 = shalt.err (!%p1256_p6)
}
 0x41a   : > { %s1260_s12 = scalar_lea.hbm %s1869_s9, 128  ;;  %s1264_s10 = scalar_lea.hbm %s2024_s4, 256 }
 0x41b   : > { %p1261_p2 = scmp.ne.s32.totalorder %s1869_s9, %s1260_s12  ;;  %p1265_p13 = scmp.lt.u32.totalorder %s1869_s9, %s2024_s4 }
 0x41c   : > { %p1266_p8 = scmp.lt.u32.totalorder %s1264_s10, %s1260_s12  ;;  %p1268_p10 = scmp.lt.u32.totalorder %s1260_s12, %s1869_s9 }
 0x41d   : > { %p1262_p9 = pnand %p1261_p2, %p2061_p1 }
 0x41e   : > { %p1267_p5 = por %p1266_p8, %p1265_p13 }
 0x41f   : > { %p1263_p12 = pneg %p1262_p9 }
 0x420   : > { %p1269_p7 = por %p1268_p10, %p1267_p5 }
 0x422   : > { %p1270_p11 = pnand %p1269_p7, %p1263_p12 }
 0x424   : > { %1273 = shalt.err (!%p1270_p11)
}
 0x425   : > { %1037 = dma.vmem_to_hbm [thread:$0]  (%p2061_p1), %s1873_s15, 128, %s1869_s9, %s1876_s14  }
 0x426   : > { %s738_s1 = sadd.s32 %s1436_s27, %s988_s8  ;;  %s741_s16 = sshll.u32 %s1703_s29, 4  ;;  %s1904_s16 = int_to_ptr.vmem [resolvable:$true] %s741_s16 }
 0x427   : > { %s979_s17 = sshll.u32 %s738_s1, 6  ;;  %s2062_s7 = sand.u32 1, %s1416_s22  }
 0x428   : > { %s1909_s10 = scalar_lea.hbm %s2023_s3, %s979_s17  ;;  %s1913_s26 = scalar_lea.sflag [#allocation7], %s2062_s7 }
 0x429   : > { %s1274_s25 = scalar_lea.vmem %s1904_s16, 256  ;;  %p2063_p3 = scmp.ne.s32.totalorder %s2051_s11, 0 }
 0x42a   : > { %p1275_p0 = scmp.ne.s32.totalorder %s1904_s16, %s1274_s25  ;;  %s1463_s27 = smov [#allocation8]  }
 0x42b   : > { %s1278_s29 = sshll.u32 %s1463_s27, 4  ;;  %s1279_s29 = int_to_ptr.vmem [resolvable:$false] %s1278_s29 }
 0x42c   : > { %p1276_p4 = pnand %p1275_p0, %p2063_p3  ;;  %s1280_s9 = scalar_lea.vmem %s1279_s29, 512 }
 0x42d   : > { %p1281_p2 = scmp.lt.s32.totalorder %s1904_s16, %s1279_s29  ;;  %p1282_p9 = scmp.lt.s32.totalorder %s1280_s9, %s1274_s25 }
 0x42e   : > { %p1277_p6 = pneg %p1276_p4 }
 0x42f   : > { %p1283_p12 = por %p1282_p9, %p1281_p2 }
 0x431   : > { %p1284_p13 = pnand %p1283_p12, %p1277_p6 }
 0x433   : > { %1287 = shalt.err (!%p1284_p13)
}
 0x434   : > { %s1288_s15 = scalar_lea.hbm %s1909_s10, 256  ;;  %s1292_s17 = scalar_lea.hbm %s2023_s3, 2048 }
 0x435   : > { %p1289_p8 = scmp.ne.s32.totalorder %s1909_s10, %s1288_s15  ;;  %p1293_p7 = scmp.lt.u32.totalorder %s1909_s10, %s2023_s3 }
 0x436   : > { %p1294_p11 = scmp.lt.u32.totalorder %s1292_s17, %s1288_s15  ;;  %p1296_p4 = scmp.lt.u32.totalorder %s1288_s15, %s1909_s10 }
 0x437   : > { %p1290_p5 = pnand %p1289_p8, %p2063_p3 }
 0x438   : > { %p1295_p0 = por %p1294_p11, %p1293_p7 }
 0x439   : > { %p1291_p10 = pneg %p1290_p5 }
 0x43a   : > { %p1297_p6 = por %p1296_p4, %p1295_p0 }
 0x43c   : > { %p1298_p2 = pnand %p1297_p6, %p1291_p10 }
 0x43e   : > { %1301 = shalt.err (!%p1298_p2)
}
 0x43f   : > { %s1464_s25 = smov 64   ;;  %s1465_s7 = smov 256  }
 0x440   : > { %s1466_s27 = smov 4   ;;  %s1942_s15 = scalar_lea.hbm %s2025_s5, %s980_s23 }
 0x441   : > { %1036 = dma.vmem_to_hbm [thread:$0]  (%p2063_p3), %s1904_s16, 256, %s1909_s10, %s1913_s26, %s1464_s25, %s1465_s7, %s1466_s27  }
 0x442   : > { %s2064_s8 = scalar_lea.vmem [#allocation11], %s1690_s18  ;;  %s1467_s12 = smov [#allocation11]  }
 0x443   : > { %s770_s1 = sshll.u32 %s2064_s8, 4  ;;  %s1306_s13 = sshll.u32 %s1467_s12, 4  ;;  %s771_s1 = int_to_ptr.vmem [resolvable:$true] %s770_s1  ;;  %s1307_s13 = int_to_ptr.vmem [resolvable:$false] %s1306_s13 }
 0x444   : > { %s1302_s17 = scalar_lea.vmem %s771_s1, 128  ;;  %s1308_s0 = scalar_lea.vmem %s1307_s13, 256 }
 0x445   : > { %p1303_p9 = scmp.ne.s32.totalorder %s771_s1, %s1302_s17  ;;  %p1309_p8 = scmp.lt.s32.totalorder %s771_s1, %s1307_s13 }
 0x446   : > { %p1310_p3 = scmp.lt.s32.totalorder %s1308_s0, %s1302_s17 }
 0x447   : > { %p1304_p12 = pnand %p1303_p9, %p2061_p1 }
 0x448   : > { %p1311_p5 = por %p1310_p3, %p1309_p8 }
 0x449   : > { %p1305_p13 = pneg %p1304_p12 }
 0x44b   : > { %p1312_p10 = pnand %p1311_p5, %p1305_p13 }
 0x44d   : > { %1315 = shalt.err (!%p1312_p10)
}
 0x44e   : > { %s1316_s28 = scalar_lea.hbm %s1942_s15, 128  ;;  %s1320_s23 = scalar_lea.hbm %s2025_s5, 256 }
 0x44f   : > { %p1317_p7 = scmp.ne.s32.totalorder %s1942_s15, %s1316_s28  ;;  %p1321_p4 = scmp.lt.u32.totalorder %s1942_s15, %s2025_s5 }
 0x450   : > { %p1322_p6 = scmp.lt.u32.totalorder %s1320_s23, %s1316_s28  ;;  %p1324_p9 = scmp.lt.u32.totalorder %s1316_s28, %s1942_s15 }
 0x451   : > { %p1318_p11 = pnand %p1317_p7, %p2061_p1 }
 0x452   : > { %p1323_p2 = por %p1322_p6, %p1321_p4 }
 0x453   : > { %p1319_p0 = pneg %p1318_p11 }
 0x454   : > { %p1325_p12 = por %p1324_p9, %p1323_p2 }
 0x456   : > { %p1326_p13 = pnand %p1325_p12, %p1319_p0 }
 0x458   : > { %1329 = shalt.err (!%p1326_p13)
}
 0x459   : > { %1038 = dma.vmem_to_hbm [thread:$0]  (%p2061_p1), %s771_s1, 128, %s1942_s15, %s1876_s14  }
 0x45a PF: > { %s2065_s0 = sld [smem:[#allocation24_spill]]  ;;  %p1057_p8 = scmp.ge.s32.totalorder %s1452_s6, 2 }
 0x45b   : > { %s782_s26 = sand.u32 1, %s1412_s21  }
 0x45c   : > { %s783_s25 = scalar_lea.sflag [#allocation7], %s782_s26 }
 0x460   : > { %p2066_p3 = scmp.ne.s32.totalorder %s2065_s0, 0 }
 0x462   : > { %p1047_p5 = pnand %p1057_p8, %p2066_p3 }
 0x464   : > { %1391 = dma.done.wait (!%p1047_p5), %s783_s25, 256  }
 0x465   : > { %1393 = vsyncadd (!%p1047_p5), %s783_s25, 4294967040  ;;  %s2067_s7 = sadd.s32 4294967294, %s1452_s6   ;;  %p2068_p10 = scmp.ne.s32.totalorder %s2057_s24, 0 }
 0x466   : > { %s791_s27 = sand.u32 1, %s2067_s7  }
 0x467   : > { %p1050_p7 = pnand %p1057_p8, %p2068_p10  ;;  %s792_s30 = scalar_lea.sflag [#allocation10], %s791_s27 }
 0x469   : > { %1395 = dma.done.wait (!%p1050_p7), %s792_s30, 256  }
 0x46a   : > { %1397 = vsyncadd (!%p1050_p7), %s792_s30, 4294967040  ;;  %s25_s6 = sadd.s32 1, %s1452_s6   ;;  %s2070_s21 = sld [smem:[#allocation25_spill]] }
 0x46b   : > { %p1973_p1 = scmp.ge.s32.totalorder %s25_s6, 10   ;;  %s2071_s29 = sld [smem:[#allocation15_spill]] }
 0x46c   : > { %s2072_s23 = sld [smem:[#allocation23_spill]]  ;;  %s2073_s24 = sld [smem:[#allocation16_spill]] }
 0x46d   : > { %s2074_s25 = sld [smem:[#allocation17_spill]]  ;;  %s2075_s26 = sld [smem:[#allocation22_spill]] }
 0x46e   : > { %s2076_s27 = sld [smem:[#allocation18_spill]]  ;;  %s2077_s28 = sld [smem:[#allocation19_spill]] }
 0x46f   : > { %s2078_s9 = sld [smem:[#allocation20_spill]]  ;;  %s2079_s30 = sld [smem:[#allocation21_spill]] }
 0x470   : > { %s2080_s18 = smov %s1404_s19  ;;  %s2081_s19 = smov %s1408_s20 }
 0x471   : > { %s2082_s20 = smov %s2070_s21  ;;  %s2083_s21 = smov %s1416_s22 }
 0x472   : > { %s2084_s22 = smov %s2071_s29  ;;  %24 = sbr.rel (!%p1973_p1) target bundleno = 15 (0xf), region = 123 }
 0x475   : > { %s2085_s29 = smov %s2078_s9 }
 0x479   :  { %806 = vsyncpa [#allocation6], 1 }
 0x47a   :  { %808 = vsyncpa [#allocation6 + $0x1], 1 }
 0x47b   :  { %809 = vsyncpa [#allocation7], 1 }
 0x47c   :  { %811 = vsyncpa [#allocation7 + $0x1], 1 }
 0x47d   :  { %812 = vsyncpa [#allocation10], 1 }
 0x47e   :  { %814 = vsyncpa [#allocation10 + $0x1], 1 }

</bundles_post_ra>
